<compile_context>
chip_gen: v7x
topology: tpu7x:2x2x1
jax: 0.10.0
libtpu: 0.0.40
codegen_flags: <defaults>
</compile_context>

<pallas_src>
import math
import functools

import jax
import jax.numpy as jnp
from jax.experimental import pallas as pl
from jax.experimental.pallas import tpu as pltpu


# --------------------------------------------------------------------------- #
# Kernels
# --------------------------------------------------------------------------- #
def _kv_proj_kernel(x_ref, w_kv_ref, b_kv_ref, k_ref, v_ref):
    """K/V projection for one (batch, seq-tile): (TQ,HD) @ (HD,2HD) + b."""
    HD = k_ref.shape[-1]
    x = x_ref[0]                                               # (TQ, HD)
    kv = jnp.dot(x, w_kv_ref[...], preferred_element_type=jnp.float32)
    kv = kv + b_kv_ref[...]                                    # f32 (TQ, 2HD) only
    k_ref[0] = kv[:, :HD].astype(k_ref.dtype)
    v_ref[0] = kv[:, HD:].astype(v_ref.dtype)


def _attn_kernel(x_ref, w_q_ref, b_q_ref, k_ref, v_ref, w_out_ref, b_out_ref,
                 bias_ref, out_ref, ctx_ref, *, num_heads, head_size,
                 compute_dtype, approx_recip):
    H, D = num_heads, head_size

    # --- Q projection for this query tile (scale folded into W_q / b_q). ---
    x = x_ref[0]                                               # (TQ, HD)
    q = jnp.dot(x, w_q_ref[...], preferred_element_type=jnp.float32)
    q = (q + b_q_ref[...]).astype(compute_dtype)               # (TQ, HD)

    k = k_ref[0]                                               # (S, HD)
    v = v_ref[0]                                               # (S, HD)
    bias = bias_ref[0]                                         # (1, S) additive f32

    # --- per-head attention; temporaries are at most (TQ, S) f32. ---
    for h in range(H):
        q_h = q[:, h * D:(h + 1) * D]
        k_h = k[:, h * D:(h + 1) * D]
        v_h = v[:, h * D:(h + 1) * D]

        s = jnp.dot(q_h, k_h.T, preferred_element_type=jnp.float32) + bias
        m = jnp.max(s, axis=-1, keepdims=True)
        e = jnp.exp(s - m)                                     # f32 (TQ, S)
        denom = jnp.sum(e, axis=-1, keepdims=True)             # (TQ, 1)

        ctx_h = jnp.dot(e.astype(compute_dtype), v_h,
                        preferred_element_type=jnp.float32)    # (TQ, D)
        # Normalize after PV: O(TQ*D) multiplies instead of O(TQ*S).
        if approx_recip:
            ctx_h = ctx_h * pl.reciprocal(denom, approx=True)
        else:
            ctx_h = ctx_h / denom
        ctx_ref[:, h * D:(h + 1) * D] = ctx_h.astype(ctx_ref.dtype)

    # merge_heads is just the scratch layout; single dense output projection.
    out = jnp.dot(ctx_ref[...], w_out_ref[...],
                  preferred_element_type=jnp.float32)
    out = out + b_out_ref[...]
    out_ref[0] = out.astype(out_ref.dtype)


# --------------------------------------------------------------------------- #
# Wrapper helpers
# --------------------------------------------------------------------------- #
def _vmem_limit_bytes():
    """Per-generation VMEM budget (v7x: 64 MiB physical; v5e/v6e: 128 MiB)."""
    try:
        cap = int(pltpu.get_tpu_info().vmem_capacity_bytes)
    except Exception:
        cap = 128 * 1024 * 1024
    return int(max(32 * 1024 * 1024, min(cap * 3 // 4, 100 * 1024 * 1024)))


def _choose_q_tile(S, num_heads, budget_bytes):
    """Pick TQ so a handful of f32 (TQ, S) score/exp slabs stay in ~1/4 budget."""
    live = 4 * max(1, min(num_heads, 4))
    tq = (budget_bytes // 4) // max(1, live * S * 4)
    tq = max(8, min(int(tq), 512, S))
    tq = (tq // 128) * 128 if tq >= 128 else (tq // 8) * 8
    return max(tq, 8)


def _mha_impl(hidden_states, params, mask, *, num_heads, head_size,
              compute_dtype, approx_recip, out_dtype, single_buffer_weights):
    B, S, HD = hidden_states.shape
    H, D = num_heads, head_size
    assert HD == H * D
    w_qkv, b_qkv, w_out, b_out = params

    def resident(block_shape, index_map):
        """Grid-invariant operand: fetched once; single-buffered if supported."""
        if single_buffer_weights:
            try:
                return pl.BlockSpec(block_shape, index_map,
                                    pipeline_mode=pl.Buffered(1))
            except Exception:          # older JAX without pipeline_mode/Buffered
                pass
        return pl.BlockSpec(block_shape, index_map)

    # ---- weight glue: PyTorch (head, chunk, dim) columns -> (chunk, head, dim)
    #      so Q / K / V form contiguous head-major column groups; fold 1/sqrt(D)
    #      into the Q weights/bias. ----
    scale = 1.0 / math.sqrt(D)
    w3 = w_qkv.T.reshape(HD, H, 3, D).transpose(0, 2, 1, 3)       # (HD, 3, H, D)
    b3 = b_qkv.reshape(H, 3, D).transpose(1, 0, 2)                # (3, H, D)
    w_q = (w3[:, 0].reshape(HD, HD) * scale).astype(compute_dtype)
    b_q = (b3[0].reshape(1, HD) * scale).astype(jnp.float32)
    w_kv = w3[:, 1:].reshape(HD, 2 * HD).astype(compute_dtype)    # [K_all | V_all]
    b_kv = b3[1:].reshape(1, 2 * HD).astype(jnp.float32)
    w_out_t = w_out.T.astype(compute_dtype)                       # (HD, HD)
    b_out_r = b_out.reshape(1, HD).astype(jnp.float32)

    vmem_limit = _vmem_limit_bytes()
    TQ = _choose_q_tile(S, H, vmem_limit)
    n_qt = -(-S // TQ)
    S_pad = n_qt * TQ

    x = hidden_states.astype(compute_dtype)
    if S_pad != S:
        x = jnp.pad(x, ((0, 0), (0, S_pad - S), (0, 0)))

    # ---- mask glue: additive bias (0 keep / -1e30 drop); padded key columns
    #      are dropped too.  NOTE: unlike masked_fill(-inf), a fully-masked row
    #      yields a uniform softmax instead of NaN. ----
    if mask is None:
        keep = jnp.ones((B, S), jnp.float32)
    else:
        m = mask
        if m.shape[-1] != S:        # mirror the reference's ones-column prepend
            m = jnp.concatenate([jnp.ones((B, 1), m.dtype), m], axis=1)
        keep = (m != 0).astype(jnp.float32)
    if S_pad != S:
        keep = jnp.pad(keep, ((0, 0), (0, S_pad - S)))
    bias = jnp.where(keep > 0, 0.0, -1e30).astype(jnp.float32).reshape(B, 1, S_pad)

    cparams = pltpu.CompilerParams(
        dimension_semantics=("parallel", "parallel"),
        vmem_limit_bytes=vmem_limit)

    # ---------------- kernel 1: K/V projection ----------------
    k_proj, v_proj = pl.pallas_call(
        _kv_proj_kernel,
        out_shape=(jax.ShapeDtypeStruct((B, S_pad, HD), compute_dtype),
                   jax.ShapeDtypeStruct((B, S_pad, HD), compute_dtype)),
        grid_spec=pltpu.PrefetchScalarGridSpec(
            num_scalar_prefetch=0,
            grid=(B, n_qt),
            in_specs=[
                pl.BlockSpec((1, TQ, HD), lambda b, i: (b, i, 0)),      # x tile
                resident((HD, 2 * HD), lambda b, i: (0, 0)),            # W_kv
                resident((1, 2 * HD), lambda b, i: (0, 0)),             # b_kv
            ],
            out_specs=[
                pl.BlockSpec((1, TQ, HD), lambda b, i: (b, i, 0)),
                pl.BlockSpec((1, TQ, HD), lambda b, i: (b, i, 0)),
            ]),
        compiler_params=cparams,
    )(x, w_kv, b_kv)

    # ------- kernel 2: Q projection + attention + output projection -------
    kernel = functools.partial(
        _attn_kernel, num_heads=H, head_size=D,
        compute_dtype=compute_dtype, approx_recip=approx_recip)

    out = pl.pallas_call(
        kernel,
        out_shape=jax.ShapeDtypeStruct((B, S_pad, HD), out_dtype),
        grid_spec=pltpu.PrefetchScalarGridSpec(
            num_scalar_prefetch=0,
            grid=(B, n_qt),
            in_specs=[
                pl.BlockSpec((1, TQ, HD), lambda b, i: (b, i, 0)),      # x (Q src)
                resident((HD, HD), lambda b, i: (0, 0)),                # W_q
                resident((1, HD), lambda b, i: (0, 0)),                 # b_q
                pl.BlockSpec((1, S_pad, HD), lambda b, i: (b, 0, 0)),   # K (per batch)
                pl.BlockSpec((1, S_pad, HD), lambda b, i: (b, 0, 0)),   # V (per batch)
                resident((HD, HD), lambda b, i: (0, 0)),                # W_out^T
                resident((1, HD), lambda b, i: (0, 0)),                 # b_out
                pl.BlockSpec((1, 1, S_pad), lambda b, i: (b, 0, 0)),    # mask bias
            ],
            out_specs=pl.BlockSpec((1, TQ, HD), lambda b, i: (b, i, 0)),
            scratch_shapes=[pltpu.VMEM((TQ, HD), compute_dtype)]),      # ctx
        compiler_params=cparams,
    )(x, w_q, b_q, k_proj, v_proj, w_out_t, b_out_r, bias)

    if S_pad != S:
        out = out[:, :S, :]
    return out


def multi_headed_attention(hidden_states, params, mask=None, *,
                           num_heads, head_size,
                           compute_dtype=jnp.bfloat16, approx_recip=True,
                           out_dtype=None):
    """Pallas equivalent of MultiHeadedAttention.forward.

    hidden_states: (B, S, num_heads*head_size) float32
    params: (w_qkv, b_qkv, w_out, b_out) in PyTorch nn.Linear layout
    mask:   optional (B, S) — 0 marks padding.
    out_dtype: pass compute_dtype to halve output DMA if the consumer allows it.
    """
    if out_dtype is None:
        out_dtype = hidden_states.dtype
    kwargs = dict(num_heads=num_heads, head_size=head_size,
                  compute_dtype=compute_dtype, approx_recip=approx_recip,
                  out_dtype=out_dtype)
    try:
        return _mha_impl(hidden_states, params, mask,
                         single_buffer_weights=True, **kwargs)
    except Exception:
        # pl.Buffered(1) pipeline_mode not supported on this JAX build:
        # retry with default double-buffered resident weights.
        return _mha_impl(hidden_states, params, mask,
                         single_buffer_weights=False, **kwargs)


# --------------------------------------------------------------------------- #
# Pure-JAX reference (mirrors the PyTorch module exactly)
# --------------------------------------------------------------------------- #
def reference_mha(x, params, mask, *, num_heads, head_size):
    w_qkv, b_qkv, w_out, b_out = params
    B, S, HD = x.shape
    qkv = x @ w_qkv.T + b_qkv
    qkv = qkv.reshape(B, S, num_heads, 3 * head_size)
    qkv = jnp.transpose(qkv, (0, 2, 1, 3))
    q, k, v = jnp.split(qkv, 3, axis=-1)
    scores = q @ jnp.swapaxes(k, 2, 3) / math.sqrt(head_size)
    if mask is not None:
        m = mask
        if m.shape[-1] != S:
            m = jnp.concatenate([jnp.ones((B, 1), m.dtype), m], axis=1)
        scores = jnp.where(m.reshape(B, 1, 1, -1) == 0, -jnp.inf, scores)
    w = jax.nn.softmax(scores, axis=-1)
    ctx = w @ v
    ctx = jnp.transpose(ctx, (0, 2, 1, 3)).reshape(B, S, HD)
    return ctx @ w_out.T + b_out


def init_params(key, num_heads, head_size):
    HD = num_heads * head_size
    k1, k2, k3, k4 = jax.random.split(key, 4)
    bound = 1.0 / math.sqrt(HD)           # nn.Linear default init scale
    w_qkv = jax.random.uniform(k1, (3 * HD, HD), jnp.float32, -bound, bound)
    b_qkv = jax.random.uniform(k2, (3 * HD,), jnp.float32, -bound, bound)
    w_out = jax.random.uniform(k3, (HD, HD), jnp.float32, -bound, bound)
    b_out = jax.random.uniform(k4, (HD,), jnp.float32, -bound, bound)
    return w_qkv, b_qkv, w_out, b_out


if __name__ == "__main__":
    H, D = 4, 8                    # num_heads, head_size
    HD = H * D
    key = jax.random.PRNGKey(0)
    kx, kp, kx2 = jax.random.split(key, 3)
    params = init_params(kp, H, D)

    # ---- test 1: B=2, S=8 (single query tile), padding mask on batch 1 ----
    B, S = 2, 8
    hidden_states = jax.random.normal(kx, (B, S, HD), jnp.float32)
    mask = jnp.array([[1] * S, [1] * (S - 2) + [0, 0]], dtype=jnp.int32)
    ref = reference_mha(hidden_states, params, mask, num_heads=H, head_size=D)

    # exact path: f32 MXU operands + exact reciprocal
    out_f32 = multi_headed_attention(hidden_states, params, mask,
                                     num_heads=H, head_size=D,
                                     compute_dtype=jnp.float32,
                                     approx_recip=False)
    out_f32 = jax.block_until_ready(out_f32)
    assert out_f32.shape == (B, S, HD)
    assert jnp.allclose(out_f32, ref, rtol=1e-4, atol=1e-4), (
        f"f32 path max abs err {jnp.max(jnp.abs(out_f32 - ref))}")

    # fast path: bf16 MXU operands + approx reciprocal
    out_bf16 = multi_headed_attention(hidden_states, params, mask,
                                      num_heads=H, head_size=D)
    out_bf16 = jax.block_until_ready(out_bf16)
    err = jnp.max(jnp.abs(out_bf16 - ref))
    assert err < 0.2, f"bf16 path max abs err {err}"

    # ---- test 2: S=12 (exercises sequence padding + multiple query tiles) ----
    S2 = 12
    hs2 = jax.random.normal(kx2, (B, S2, HD), jnp.float32)
    mask2 = jnp.concatenate(
        [jnp.ones((B, S2 - 3), jnp.int32),
         jnp.array([[1, 1, 1], [0, 0, 0]], jnp.int32)], axis=1)
    ref2 = reference_mha(hs2, params, mask2, num_heads=H, head_size=D)
    out2 = multi_headed_attention(hs2, params, mask2, num_heads=H, head_size=D,
                                  compute_dtype=jnp.float32, approx_recip=False)
    out2 = jax.block_until_ready(out2)
    assert out2.shape == (B, S2, HD)
    assert jnp.allclose(out2, ref2, rtol=1e-4, atol=1e-4), (
        f"padded path max abs err {jnp.max(jnp.abs(out2 - ref2))}")

    print("KERNEL_OK")
</pallas_src>

<mosaic_0001>
module attributes {stable_mosaic.version = 11 : i64} {
  func.func @_kv_proj_kernel(%arg0: i32, %arg1: i32, %arg2: memref<1x8x32xf32, #tpu.memory_space<vmem>>, %arg3: memref<32x64xf32, #tpu.memory_space<vmem>>, %arg4: memref<1x64xf32, #tpu.memory_space<vmem>>, %arg5: memref<1x8x32xf32, #tpu.memory_space<vmem>>, %arg6: memref<1x8x32xf32, #tpu.memory_space<vmem>>) attributes {dimension_semantics = [#tpu.dimension_semantics<parallel>, #tpu.dimension_semantics<parallel>], iteration_bounds = array<i64: 2, 1>, scalar_prefetch = 0 : i64, scratch_operands = 0 : i64, tpu.core_type = #tpu.core_type<tc>, window_params = [{transform_indices = @transform_0, window_bounds = array<i64: 1, 8, 32>}, {pipeline_mode = #tpu.pipeline_mode<synchronous>, transform_indices = @transform_1, window_bounds = array<i64: 32, 64>}, {pipeline_mode = #tpu.pipeline_mode<synchronous>, transform_indices = @transform_2, window_bounds = array<i64: 1, 64>}, {transform_indices = @transform_3, window_bounds = array<i64: 1, 8, 32>}, {transform_indices = @transform_4, window_bounds = array<i64: 1, 8, 32>}]} {
    %c0 = arith.constant 0 : index
    %c0_0 = arith.constant 0 : index
    %c0_1 = arith.constant 0 : index
    %0 = vector.load %arg2[%c0, %c0_0, %c0_1] : memref<1x8x32xf32, #tpu.memory_space<vmem>>, vector<1x8x32xf32>
    %1 = vector.shape_cast %0 : vector<1x8x32xf32> to vector<8x32xf32>
    %c0_2 = arith.constant 0 : index
    %c0_3 = arith.constant 0 : index
    %2 = vector.load %arg3[%c0_2, %c0_3] : memref<32x64xf32, #tpu.memory_space<vmem>>, vector<32x64xf32>
    %cst = arith.constant dense<0.000000e+00> : vector<8x64xf32>
    %3 = tpu.matmul %1, %2, %cst {dimension_numbers = #tpu.dot_dimension_numbers<[1], [0], [0], [1], [0, 0, 1, 1], [], []>} : vector<8x32xf32>, vector<32x64xf32>, vector<8x64xf32> -> vector<8x64xf32>
    %c0_4 = arith.constant 0 : index
    %c0_5 = arith.constant 0 : index
    %4 = vector.load %arg4[%c0_4, %c0_5] : memref<1x64xf32, #tpu.memory_space<vmem>>, vector<1x64xf32>
    %5 = vector.broadcast %4 : vector<1x64xf32> to vector<8x64xf32>
    %6 = arith.addf %3, %5 : vector<8x64xf32>
    %7 = vector.extract_strided_slice %6 {offsets = [0, 0], sizes = [8, 32], strides = [1, 1]} : vector<8x64xf32> to vector<8x32xf32>
    %c0_6 = arith.constant 0 : index
    %c0_7 = arith.constant 0 : index
    %c0_8 = arith.constant 0 : index
    %8 = vector.load %arg5[%c0_6, %c0_7, %c0_8] : memref<1x8x32xf32, #tpu.memory_space<vmem>>, vector<1x8x32xf32>
    %9 = vector.shape_cast %8 : vector<1x8x32xf32> to vector<8x32xf32>
    %10 = vector.shape_cast %7 : vector<8x32xf32> to vector<1x8x32xf32>
    tpu.vector_store %arg5[%c0_6, %c0_7, %c0_8], %10 {strides = array<i32>} : memref<1x8x32xf32, #tpu.memory_space<vmem>>, vector<1x8x32xf32>,
    %11 = vector.extract_strided_slice %6 {offsets = [0, 32], sizes = [8, 32], strides = [1, 1]} : vector<8x64xf32> to vector<8x32xf32>
    %c0_9 = arith.constant 0 : index
    %c0_10 = arith.constant 0 : index
    %c0_11 = arith.constant 0 : index
    %12 = vector.load %arg6[%c0_9, %c0_10, %c0_11] : memref<1x8x32xf32, #tpu.memory_space<vmem>>, vector<1x8x32xf32>
    %13 = vector.shape_cast %12 : vector<1x8x32xf32> to vector<8x32xf32>
    %14 = vector.shape_cast %11 : vector<8x32xf32> to vector<1x8x32xf32>
    tpu.vector_store %arg6[%c0_9, %c0_10, %c0_11], %14 {strides = array<i32>} : memref<1x8x32xf32, #tpu.memory_space<vmem>>, vector<1x8x32xf32>,
    return
  }
  func.func @transform_0(%arg0: i32, %arg1: i32) -> (i32, i32, i32) {
    %c0_i32 = arith.constant 0 : i32
    %c0_i32_0 = arith.constant 0 : i32
    return %arg0, %arg1, %c0_i32 : i32, i32, i32
  }
  func.func @transform_1(%arg0: i32, %arg1: i32) -> (i32, i32) {
    %c0_i32 = arith.constant 0 : i32
    %c0_i32_0 = arith.constant 0 : i32
    %c0_i32_1 = arith.constant 0 : i32
    return %c0_i32, %c0_i32_0 : i32, i32
  }
  func.func @transform_2(%arg0: i32, %arg1: i32) -> (i32, i32) {
    %c0_i32 = arith.constant 0 : i32
    %c0_i32_0 = arith.constant 0 : i32
    %c0_i32_1 = arith.constant 0 : i32
    return %c0_i32, %c0_i32_0 : i32, i32
  }
  func.func @transform_3(%arg0: i32, %arg1: i32) -> (i32, i32, i32) {
    %c0_i32 = arith.constant 0 : i32
    %c0_i32_0 = arith.constant 0 : i32
    return %arg0, %arg1, %c0_i32 : i32, i32, i32
  }
  func.func @transform_4(%arg0: i32, %arg1: i32) -> (i32, i32, i32) {
    %c0_i32 = arith.constant 0 : i32
    %c0_i32_0 = arith.constant 0 : i32
    return %arg0, %arg1, %c0_i32 : i32, i32, i32
  }
}

module attributes {stable_mosaic.version = 11 : i64} {
  func.func @_kv_proj_kernel(%arg0: i32, %arg1: i32, %arg2: memref<1x8x32xf32, #tpu.memory_space<vmem>>, %arg3: memref<32x64xf32, #tpu.memory_space<vmem>>, %arg4: memref<1x64xf32, #tpu.memory_space<vmem>>, %arg5: memref<1x8x32xf32, #tpu.memory_space<vmem>>, %arg6: memref<1x8x32xf32, #tpu.memory_space<vmem>>) attributes {dimension_semantics = [#tpu.dimension_semantics<parallel>, #tpu.dimension_semantics<parallel>], iteration_bounds = array<i64: 2, 1>, scalar_prefetch = 0 : i64, scratch_operands = 0 : i64, tpu.core_type = #tpu.core_type<tc>, window_params = [{transform_indices = @transform_0, window_bounds = array<i64: 1, 8, 32>}, {pipeline_mode = #tpu.pipeline_mode<synchronous>, transform_indices = @transform_1, window_bounds = array<i64: 32, 64>}, {pipeline_mode = #tpu.pipeline_mode<synchronous>, transform_indices = @transform_2, window_bounds = array<i64: 1, 64>}, {transform_indices = @transform_3, window_bounds = array<i64: 1, 8, 32>}, {transform_indices = @transform_4, window_bounds = array<i64: 1, 8, 32>}]} {
    %c0 = arith.constant 0 : index
    %c0_0 = arith.constant 0 : index
    %c0_1 = arith.constant 0 : index
    %0 = vector.load %arg2[%c0, %c0_0, %c0_1] : memref<1x8x32xf32, #tpu.memory_space<vmem>>, vector<1x8x32xf32>
    %1 = vector.shape_cast %0 : vector<1x8x32xf32> to vector<8x32xf32>
    %c0_2 = arith.constant 0 : index
    %c0_3 = arith.constant 0 : index
    %2 = vector.load %arg3[%c0_2, %c0_3] : memref<32x64xf32, #tpu.memory_space<vmem>>, vector<32x64xf32>
    %cst = arith.constant dense<0.000000e+00> : vector<8x64xf32>
    %3 = tpu.matmul %1, %2, %cst {dimension_numbers = #tpu.dot_dimension_numbers<[1], [0], [0], [1], [0, 0, 1, 1], [], []>} : vector<8x32xf32>, vector<32x64xf32>, vector<8x64xf32> -> vector<8x64xf32>
    %c0_4 = arith.constant 0 : index
    %c0_5 = arith.constant 0 : index
    %4 = vector.load %arg4[%c0_4, %c0_5] : memref<1x64xf32, #tpu.memory_space<vmem>>, vector<1x64xf32>
    %5 = vector.broadcast %4 : vector<1x64xf32> to vector<8x64xf32>
    %6 = arith.addf %3, %5 : vector<8x64xf32>
    %7 = vector.extract_strided_slice %6 {offsets = [0, 0], sizes = [8, 32], strides = [1, 1]} : vector<8x64xf32> to vector<8x32xf32>
    %c0_6 = arith.constant 0 : index
    %c0_7 = arith.constant 0 : index
    %c0_8 = arith.constant 0 : index
    %8 = vector.load %arg5[%c0_6, %c0_7, %c0_8] : memref<1x8x32xf32, #tpu.memory_space<vmem>>, vector<1x8x32xf32>
    %9 = vector.shape_cast %8 : vector<1x8x32xf32> to vector<8x32xf32>
    %10 = vector.shape_cast %7 : vector<8x32xf32> to vector<1x8x32xf32>
    tpu.vector_store %arg5[%c0_6, %c0_7, %c0_8], %10 {strides = array<i32>} : memref<1x8x32xf32, #tpu.memory_space<vmem>>, vector<1x8x32xf32>,
    %11 = vector.extract_strided_slice %6 {offsets = [0, 32], sizes = [8, 32], strides = [1, 1]} : vector<8x64xf32> to vector<8x32xf32>
    %c0_9 = arith.constant 0 : index
    %c0_10 = arith.constant 0 : index
    %c0_11 = arith.constant 0 : index
    %12 = vector.load %arg6[%c0_9, %c0_10, %c0_11] : memref<1x8x32xf32, #tpu.memory_space<vmem>>, vector<1x8x32xf32>
    %13 = vector.shape_cast %12 : vector<1x8x32xf32> to vector<8x32xf32>
    %14 = vector.shape_cast %11 : vector<8x32xf32> to vector<1x8x32xf32>
    tpu.vector_store %arg6[%c0_9, %c0_10, %c0_11], %14 {strides = array<i32>} : memref<1x8x32xf32, #tpu.memory_space<vmem>>, vector<1x8x32xf32>,
    return
  }
  func.func @transform_0(%arg0: i32, %arg1: i32) -> (i32, i32, i32) {
    %c0_i32 = arith.constant 0 : i32
    %c0_i32_0 = arith.constant 0 : i32
    return %arg0, %arg1, %c0_i32 : i32, i32, i32
  }
  func.func @transform_1(%arg0: i32, %arg1: i32) -> (i32, i32) {
    %c0_i32 = arith.constant 0 : i32
    %c0_i32_0 = arith.constant 0 : i32
    %c0_i32_1 = arith.constant 0 : i32
    return %c0_i32, %c0_i32_0 : i32, i32
  }
  func.func @transform_2(%arg0: i32, %arg1: i32) -> (i32, i32) {
    %c0_i32 = arith.constant 0 : i32
    %c0_i32_0 = arith.constant 0 : i32
    %c0_i32_1 = arith.constant 0 : i32
    return %c0_i32, %c0_i32_0 : i32, i32
  }
  func.func @transform_3(%arg0: i32, %arg1: i32) -> (i32, i32, i32) {
    %c0_i32 = arith.constant 0 : i32
    %c0_i32_0 = arith.constant 0 : i32
    return %arg0, %arg1, %c0_i32 : i32, i32, i32
  }
  func.func @transform_4(%arg0: i32, %arg1: i32) -> (i32, i32, i32) {
    %c0_i32 = arith.constant 0 : i32
    %c0_i32_0 = arith.constant 0 : i32
    return %arg0, %arg1, %c0_i32 : i32, i32, i32
  }
}

</mosaic_0001>

<bundles_post_ra>
// kernel: tpu_custom_call.1
= control target key start
LH: loop header
LB: loop body
LE: loop exit
PB: predicated region body
PF: predicated region fallthrough
CT: control target
= control target key end

     0   :  { %10 = vsyncpa [#allocation3], 0  ;;  %s1200_s0 = inlined_call_operand.hbm [shape: f32[2,8,32], index: 0, kind: input, shape index: {}]   ;;  %s1201_s1 = inlined_call_operand.hbm [shape: f32[32,64], index: 1, kind: input, shape index: {}]   ;;  %s1202_s2 = inlined_call_operand.hbm [shape: f32[1,64], index: 2, kind: input, shape index: {}]   ;;  %s1203_s3 = inlined_call_operand.hbm [shape: f32[2,8,32], index: 3, kind: output, shape index: {0}]   ;;  %s1204_s4 = inlined_call_operand.hbm [shape: f32[2,8,32], index: 4, kind: output, shape index: {1}]  }
   0x1   :  { %12 = vsyncpa [#allocation3 + $0x1], 0 }
   0x2   :  { %13 = vsyncpa [#allocation6], 0 }
   0x3   :  { %14 = vsyncpa [#allocation4], 0 }
   0x4   :  { %16 = vsyncpa [#allocation4 + $0x1], 0 }
   0x5   :  { %17 = vsyncpa [#allocation10], 0 }
   0x6   :  { %19 = vsyncpa [#allocation10 + $0x1], 0  ;;  %s908_s15 = smov 0   ;;  %s910_s16 = smov 0  }
   0x7   :  { %s912_s17 = smov 0   ;;  %s914_s18 = smov 0  }
   0x8   :  { %s916_s19 = smov 0   ;;  %s918_s20 = smov 0  }
   0x9 LB: > { %s528_s21 = sadd.s32 4294967295, %s870_s20   ;;  %s529_s22 = sadd.s32 4294967294, %s870_s20   ;;  %s870_s20 = sphi %s918_s20, %s25_s20   ;;  %s866_s19 = sphi %s916_s19, %s1226_s19   ;;  %s862_s18 = sphi %s914_s18, %s1225_s18   ;;  %s858_s17 = sphi %s912_s17, %s1224_s17   ;;  %s854_s16 = sphi %s910_s16, %s1223_s16   ;;  %s850_s15 = sphi %s908_s15, %s1222_s15  }
   0xa   : > { %p59_p0 = scmp.ne.s32.totalorder %s854_s16, %s850_s15  ;;  %p942_p1 = scmp.eq.s32.totalorder %s528_s21, 0 }
   0xb   : > { %p946_p2 = scmp.eq.s32.totalorder %s528_s21, 1  ;;  %p133_p3 = scmp.eq.s32.totalorder %s529_s22, 1 }
   0xc   : > { %s1209_s23 = scalar_select %p942_p1, 1, 0 }
   0xd   : > { %p952_p4 = por %p942_p1, %p59_p0  ;;  %p530_p5 = scmp.ge.s32.totalorder %s870_s20, 1 }
   0xe   : > { %p957_p6 = por %p133_p3, %p59_p0  ;;  %p168_p7 = scmp.lt.s32.totalorder %s870_s20, 3 }
   0xf   : > { %s1211_s25 = scalar_select %p952_p4, 1, 0 }
  0x10   : > { %s1212_s26 = scalar_select %p957_p6, 1, 0 }
  0x11   : > { %p962_p8 = pnand %p530_p5, %p168_p7  ;;  %s872_s28 = smov [#allocation5]  }
  0x12   : > { %s180_s29 = sshll.u32 %s872_s28, 4  ;;  %s873_s5 = smov [#allocation7]   ;;  %s966_s29 = int_to_ptr.vmem [resolvable:$true] %s180_s29 }
  0x13   : > { %p586_p9 = pneg %p962_p8  ;;  %s194_s6 = sshll.u32 %s873_s5, 4  ;;  %s977_s6 = int_to_ptr.vmem [resolvable:$true] %s194_s6 }
  0x14   : > { %s666_s9 = scalar_lea.hbm %s1201_s1, 512 }
  0x15   : > { %p973_p11 = pnand %p586_p9, %p942_p1  ;;  %p667_p12 = scmp.ne.s32.totalorder %s1201_s1, %s666_s9 }
  0x16   : > { %p673_p5 = scmp.lt.u32.totalorder %s666_s9, %s1201_s1 }
  0x17   : > { %p668_p13 = pneg %p973_p11 }
  0x19   : > { %p669_p0 = pnand %p668_p13, %p667_p12 }
  0x1b   : > { %p670_p3 = pneg %p669_p0 }
  0x1d   : > { %p675_p7 = pnand %p673_p5, %p670_p3 }
  0x1f   : > { %678 = shalt.err (!%p675_p7)
}
  0x20   : > { %s679_s14 = scalar_lea.vmem %s966_s29, 512  ;;  %p687_p1 = scmp.lt.s32.totalorder %s966_s29, %s966_s29 }
  0x21   : > { %p680_p9 = scmp.ne.s32.totalorder %s966_s29, %s679_s14  ;;  %p688_p12 = scmp.lt.s32.totalorder %s679_s14, %s679_s14 }
  0x23   : > { %p682_p10 = pnand %p680_p9, %p668_p13  ;;  %p689_p0 = por %p688_p12, %p687_p1 }
  0x25   : > { %p683_p6 = pneg %p682_p10 }
  0x27   : > { %p690_p4 = pnand %p689_p0, %p683_p6 }
  0x29   : > { %693 = shalt.err (!%p690_p4)
}
  0x2a   : > { %s874_s21 = smov 128   ;;  %s875_s22 = smov 8  }
  0x2b   : > { %589 = dma.hbm_to_vmem [thread:$0]  (!%p973_p11), %s1201_s1, 512, %s966_s29, [#allocation6], %s874_s21, %s874_s21, %s875_s22  }
  0x2c   : > { %s694_s9 = scalar_lea.hbm %s1202_s2, 16 }
  0x2d   : > { %p695_p1 = scmp.ne.s32.totalorder %s1202_s2, %s694_s9  ;;  %p701_p10 = scmp.lt.u32.totalorder %s694_s9, %s1202_s2 }
  0x2f   : > { %p697_p4 = pnand %p695_p1, %p668_p13 }
  0x31   : > { %p698_p6 = pneg %p697_p4 }
  0x33   : > { %p703_p3 = pnand %p701_p10, %p698_p6 }
  0x35   : > { %706 = shalt.err (!%p703_p3)
}
  0x36   : > { %s707_s29 = scalar_lea.vmem %s977_s6, 16  ;;  %s714_s14 = scalar_lea.vmem %s977_s6, 32 }
  0x37   : > { %p708_p5 = scmp.ne.s32.totalorder %s977_s6, %s707_s29  ;;  %p715_p12 = scmp.lt.s32.totalorder %s977_s6, %s977_s6 }
  0x38   : > { %p716_p0 = scmp.lt.s32.totalorder %s714_s14, %s707_s29 }
  0x39   : > { %p710_p7 = pnand %p708_p5, %p668_p13 }
  0x3a   : > { %p717_p1 = por %p716_p0, %p715_p12 }
  0x3b   : > { %p711_p9 = pneg %p710_p7 }
  0x3d   : > { %p718_p4 = pnand %p717_p1, %p711_p9 }
  0x3f   : > { %721 = shalt.err (!%p718_p4)
}
  0x40   : > { %592 = dma.hbm_to_vmem [thread:$0]  (!%p973_p11), %s1202_s2, 16, %s977_s6, [#allocation6]  }
  0x41   : > { %s37_s28 = sadd.s32 1, %s866_s19  ;;  %s46_s5 = sadd.s32 1, %s858_s17 }
  0x42   : > { %p39_p13 = scmp.ge.s32.totalorder %s37_s28, 2  ;;  %p53_p6 = scmp.ne.s32.totalorder %s858_s17, %s854_s16 }
  0x43   : > { %p54_p10 = scmp.eq.s32.totalorder %s870_s20, 0  ;;  %p606_p3 = scmp.lt.s32.totalorder %s870_s20, 2 }
  0x44   : > { %s1228_s28 = smov (%p39_p13, %s37_s28), 0  ;;  %p1042_p7 = por %p946_p2, %p53_p6 }
  0x45   : > { %p55_p5 = por %p54_p10, %p53_p6  ;;  %s41_s7 = ssub.s32 %s866_s19, %s1228_s28 }
  0x46   : > { %s1215_s30 = scalar_select %p1042_p7, 1, 0 }
  0x47   : > { %s205_s8 = sand.u32 1, %s858_s17   ;;  %p44_p9 = scmp.eq.s32.totalorder %s41_s7, 0 }
  0x48   : > { %s534_s6 = sshll.u32 %s205_s8, 3  ;;  %s535_s9 = sshll.u32 %s866_s19, 7 }
  0x49   : > { %s1051_s10 = scalar_select %p44_p9, %s858_s17, %s46_s5  }
  0x4a   : > { %s1056_s13 = scalar_lea.hbm %s1200_s0, %s535_s9  ;;  %s209_s24 = scalar_lea.vmem [#allocation2], %s534_s6 }
  0x4b   : > { %s217_s29 = sshll.u32 %s209_s24, 4  ;;  %p1060_p2 = pnand %p606_p3, %p55_p5  ;;  %s1064_s29 = int_to_ptr.vmem [resolvable:$true] %s217_s29 }
  0x4c   : > { %s206_s21 = scalar_lea.sflag [#allocation3], %s205_s8  ;;  %s722_s22 = scalar_lea.hbm %s1056_s13, 128 }
  0x4d   : > { %p723_p11 = scmp.ne.s32.totalorder %s1056_s13, %s722_s22  ;;  %p724_p12 = pneg %p1060_p2 }
  0x4e   : > { %s727_s6 = scalar_lea.hbm %s1200_s0, 256  ;;  %p728_p4 = scmp.lt.u32.totalorder %s1056_s13, %s1200_s0 }
  0x4f   : > { %p725_p0 = pnand %p724_p12, %p723_p11  ;;  %p729_p13 = scmp.lt.u32.totalorder %s727_s6, %s722_s22 }
  0x50   : > { %p731_p10 = scmp.lt.u32.totalorder %s722_s22, %s1056_s13 }
  0x51   : > { %p726_p1 = pneg %p725_p0  ;;  %p730_p6 = por %p729_p13, %p728_p4 }
  0x53   : > { %p732_p3 = por %p731_p10, %p730_p6 }
  0x55   : > { %p733_p5 = pnand %p732_p3, %p726_p1 }
  0x57   : > { %736 = shalt.err (!%p733_p5)
}
  0x58   : > { %s737_s8 = scalar_lea.vmem %s1064_s29, 128  ;;  %s876_s12 = smov [#allocation2]  }
  0x59   : > { %p738_p9 = scmp.ne.s32.totalorder %s1064_s29, %s737_s8  ;;  %s742_s24 = sshll.u32 %s876_s12, 4  ;;  %s743_s24 = int_to_ptr.vmem [resolvable:$false] %s742_s24 }
  0x5a   : > { %s744_s5 = scalar_lea.vmem %s743_s24, 256  ;;  %p745_p7 = scmp.lt.s32.totalorder %s1064_s29, %s743_s24 }
  0x5b   : > { %p740_p11 = pnand %p738_p9, %p724_p12  ;;  %p746_p4 = scmp.lt.s32.totalorder %s744_s5, %s737_s8 }
  0x5d   : > { %p741_p0 = pneg %p740_p11  ;;  %p747_p13 = por %p746_p4, %p745_p7 }
  0x5f   : > { %p748_p6 = pnand %p747_p13, %p741_p0 }
  0x61   : > { %751 = shalt.err (!%p748_p6)
}
  0x62   : > { %596 = dma.hbm_to_vmem [thread:$0]  (!%p1060_p2), %s1056_s13, 128, %s1064_s29, %s206_s21  }
  0x63   : > { %226 = sbr.rel (%p962_p8) target bundleno = 464 (0x1d0), region = 32  ;;  %s1094_s22 = sand.u32 (!%p962_p8), 1, %s854_s16  }
  0x64   : > { %s1097_s7 = sshll.u32 (!%p962_p8), %s1094_s22, 3  ;;  %s229_s6 = scalar_lea.sflag (!%p962_p8), [#allocation3], %s1094_s22 }
  0x65   : > { %s232_s9 = scalar_lea.vmem (!%p962_p8), [#allocation2], %s1097_s7  ;;  %p1217_p7 = scmp.ne.s32.totalorder (!%p962_p8), %s1211_s25, 0 }
  0x6a   : > { %833 = dma.done.wait (%p1217_p7), %s229_s6, 128  }
  0x6b   : > { %835 = vsyncadd (%p1217_p7), %s229_s6, 4294967168  ;;  %p1218_p2 = scmp.ne.s32.totalorder %s1209_s23, 0 }
  0x6d   : > { %837 = dma.done.wait (%p1218_p2), [#allocation6], 528  }
  0x6e   : > { %839 = vsyncadd (%p1218_p2), [#allocation6], 4294966768  ;;  %v877_v0 = vmov 0.0|0.0   ;;  %vm878_vm0 = vmmov 0   ;;  %v879_v1 = vmov 0.0   ;;  %v271_v2 = vld [vmem:[#allocation5] sm:$0xff] }
  0x6f   : > { %566 = vmatprep.subr.bf16.mxu0 %v877_v0  ;;  %563 = vmatprep.mubr.msk.f32.mxu0 %vm878_vm0, %v879_v1  ;;  %v272_v3 = vld [vmem:[#allocation5 + $0x8] sm:$0xff]  ;;  %v273_v4 = vld [vmem:[#allocation5 + $0x10] sm:$0xff]  ;;  %v274_v6 = vld [vmem:[#allocation5 + $0x18] sm:$0xff]  ;;  %vm282_vm1 = vcmask 261120   ;;  %s546_s23 = sshll.u32 %s862_s18, 7  ;;  %s262_s25 = scalar_lea.vmem [#allocation8], %s1097_s7 }
  0x70   : > { %v567_v5 = vpack.c.bf16 %v272_v3, %v271_v2  ;;  %v570_v7 = vpack.c.bf16 %v274_v6, %v273_v4  ;;  %v270_v8 = vld [vmem:[%s232_s9] sm:$0xff]  ;;  %v542_v9 = vld [vmem:[#allocation7] ss:$0 sm:$0xff]  ;;  %s382_s27 = sshll.u32 %s262_s25, 4  ;;  %s1117_s14 = scalar_lea.hbm %s1203_s3, %s546_s23  ;;  %s1119_s27 = int_to_ptr.vmem [resolvable:$true] %s382_s27 }
  0x71   : > { %s880_s21 = smov 96   ;;  %s363_s11 = scalar_lea.sflag [#allocation4], %s1094_s22 }
  0x72   : > { %568 = vmatpush3.bf16.msra.mxu0 %v567_v5  ;;  %s752_s8 = scalar_lea.vmem %s1119_s27, 128  ;;  %p1219_p12 = scmp.ne.s32.totalorder %s1215_s30, 0 }
  0x73   : > { %569 = vmatprep.subr.bf16.mxu0 %v877_v0  ;;  %p753_p8 = scmp.ne.s32.totalorder %s1119_s27, %s752_s8  ;;  %s881_s12 = smov [#allocation8]  }
  0x74   : > { %s756_s24 = sshll.u32 %s881_s12, 4  ;;  %s757_s24 = int_to_ptr.vmem [resolvable:$false] %s756_s24 }
  0x75   : > { %p754_p1 = pnand %p753_p8, %p1219_p12  ;;  %s758_s5 = scalar_lea.vmem %s757_s24, 256 }
  0x76   : > { %571 = vmatpush3.bf16.msra.mxu0 %v570_v7  ;;  %p759_p3 = scmp.lt.s32.totalorder %s1119_s27, %s757_s24  ;;  %p760_p5 = scmp.lt.s32.totalorder %s758_s5, %s752_s8 }
  0x77   : > { %p755_p10 = pneg %p754_p1 }
  0x78   : > { %p761_p9 = por %p760_p5, %p759_p3 }
  0x79   : > { %564 = vmatmul.mubr.msk.f32.vlgmr.msra.gmra.mrb[0].mxu0 %vm282_vm1, %v270_v8 }
  0x7a   : > { %p762_p11 = pnand %p761_p9, %p755_p10 }
 0x14c   : > { %v352_v10 = vpop.f32.mrb[0].mxu0 }
 0x14d   : > { %v353_v11 = vadd.f32 %v542_v9, %v352_v10  ;;  %v565_v12 = vpop.f32.mrb[1].mxu0 }
 0x14f   : > { %358 = vrot.lane.b32.xlu0 %v353_v11, %s880_s21  ;;  %356 = vst.msk [vmem:[%s262_s25] sm:$0xff] %vm282_vm1, %v353_v11 }
 0x150   : > { %765 = shalt.err (!%p762_p11)
}
 0x151   : > { %s766_s6 = scalar_lea.hbm %s1117_s14, 128  ;;  %s770_s13 = scalar_lea.hbm %s1203_s3, 256 }
 0x152   : > { %p767_p0 = scmp.ne.s32.totalorder %s1117_s14, %s766_s6  ;;  %p771_p6 = scmp.lt.u32.totalorder %s1117_s14, %s1203_s3 }
 0x153   : > { %p772_p7 = scmp.lt.u32.totalorder %s770_s13, %s766_s6  ;;  %p774_p8 = scmp.lt.u32.totalorder %s766_s6, %s1117_s14 }
 0x154   : > { %p768_p4 = pnand %p767_p0, %p1219_p12 }
 0x155   : > { %p773_p2 = por %p772_p7, %p771_p6 }
 0x156   : > { %p769_p13 = pneg %p768_p4 }
 0x157   : > { %p775_p1 = por %p774_p8, %p773_p2 }
 0x159   : > { %p776_p10 = pnand %p775_p1, %p769_p13 }
 0x15b   : > { %779 = shalt.err (!%p776_p10)
}
 0x15c   : > { %582 = dma.vmem_to_hbm [thread:$0]  (%p1219_p12), %s1119_s27, 128, %s1117_s14, %s363_s11  }
 0x15d   : > { %s269_s8 = scalar_lea.vmem [#allocation9], %s1097_s7  ;;  %s1150_s9 = scalar_lea.hbm %s1204_s4, %s546_s23 }
 0x15e   : > { %s396_s12 = sshll.u32 %s269_s8, 4  ;;  %s368_s6 = scalar_lea.sflag [#allocation10], %s1094_s22  ;;  %s1152_s12 = int_to_ptr.vmem [resolvable:$true] %s396_s12 }
 0x15f   : > { %s780_s25 = scalar_lea.vmem %s1152_s12, 128  ;;  %s882_s18 = smov [#allocation9]  }
 0x160   : > { %p781_p3 = scmp.ne.s32.totalorder %s1152_s12, %s780_s25  ;;  %s784_s7 = sshll.u32 %s882_s18, 4  ;;  %s785_s7 = int_to_ptr.vmem [resolvable:$false] %s784_s7 }
 0x161   : > { %s786_s27 = scalar_lea.vmem %s785_s7, 256  ;;  %p787_p11 = scmp.lt.s32.totalorder %s1152_s12, %s785_s7 }
 0x162   : > { %p782_p5 = pnand %p781_p3, %p1219_p12  ;;  %p788_p0 = scmp.lt.s32.totalorder %s786_s27, %s780_s25 }
 0x164   : > { %p783_p9 = pneg %p782_p5  ;;  %p789_p4 = por %p788_p0, %p787_p11 }
 0x166   : > { %p790_p13 = pnand %p789_p4, %p783_p9 }
 0x1c1   : > { %v359_v13 = vpop.permute.xlu0 %358 }
 0x1c2   : > { %361 = vst.msk [vmem:[%s269_s8] sm:$0xff] %vm282_vm1, %v359_v13 }
 0x1c3   : > { %793 = shalt.err (!%p790_p13)
}
 0x1c4   : > { %s794_s22 = scalar_lea.hbm %s1150_s9, 128  ;;  %s798_s11 = scalar_lea.hbm %s1204_s4, 256 }
 0x1c5   : > { %p795_p6 = scmp.ne.s32.totalorder %s1150_s9, %s794_s22  ;;  %p799_p8 = scmp.lt.u32.totalorder %s1150_s9, %s1204_s4 }
 0x1c6   : > { %p800_p1 = scmp.lt.u32.totalorder %s798_s11, %s794_s22  ;;  %p802_p3 = scmp.lt.u32.totalorder %s794_s22, %s1150_s9 }
 0x1c7   : > { %p796_p7 = pnand %p795_p6, %p1219_p12 }
 0x1c8   : > { %p801_p10 = por %p800_p1, %p799_p8 }
 0x1c9   : > { %p797_p2 = pneg %p796_p7 }
 0x1ca   : > { %p803_p5 = por %p802_p3, %p801_p10 }
 0x1cc   : > { %p804_p9 = pnand %p803_p5, %p797_p2 }
 0x1ce   : > { %807 = shalt.err (!%p804_p9)
}
 0x1cf   : > { %583 = dma.vmem_to_hbm [thread:$0]  (%p1219_p12), %s1152_s12, 128, %s1150_s9, %s368_s6  }
 0x1d0 PF: > { %s408_s21 = sand.u32 1, %s850_s15   ;;  %p1220_p11 = scmp.ne.s32.totalorder %s1212_s26, 0 }
 0x1d1   : > { %p1221_p0 = scmp.ge.s32.totalorder %s870_s20, 2  ;;  %s409_s8 = scalar_lea.sflag [#allocation4], %s408_s21 }
 0x1d3   : > { %p598_p4 = pnand %p1221_p0, %p1220_p11 }
 0x1d5   : > { %841 = dma.done.wait (!%p598_p4), %s409_s8, 128  }
 0x1d6   : > { %843 = vsyncadd (!%p598_p4), %s409_s8, 4294967168  ;;  %s418_s24 = scalar_lea.sflag [#allocation10], %s408_s21 }
 0x1d7   : > { %845 = dma.done.wait (!%p598_p4), %s418_s24, 128  }
 0x1d8   : > { %847 = vsyncadd (!%p598_p4), %s418_s24, 4294967168  ;;  %s25_s20 = sadd.s32 1, %s870_s20   ;;  %s1222_s15 = smov %s854_s16 }
 0x1d9   : > { %p22_p13 = scmp.ge.s32.totalorder %s25_s20, 4   ;;  %s1223_s16 = smov %s858_s17 }
 0x1da   : > { %s1224_s17 = smov %s1051_s10  ;;  %s1225_s18 = smov %s866_s19 }
 0x1db   : > { %s1226_s19 = smov %s1228_s28  ;;  %24 = sbr.rel (!%p22_p13) target bundleno = 9 (0x9), region = 102 }
 0x1e2   :  { %423 = vsyncpa [#allocation3], 1 }
 0x1e3   :  { %425 = vsyncpa [#allocation3 + $0x1], 1 }
 0x1e4   :  { %426 = vsyncpa [#allocation6], 1 }
 0x1e5   :  { %427 = vsyncpa [#allocation4], 1 }
 0x1e6   :  { %429 = vsyncpa [#allocation4 + $0x1], 1 }
 0x1e7   :  { %430 = vsyncpa [#allocation10], 1 }
 0x1e8   :  { %432 = vsyncpa [#allocation10 + $0x1], 1 }

// kernel: tpu_custom_call.1
= control target key start
LH: loop header
LB: loop body
LE: loop exit
PB: predicated region body
PF: predicated region fallthrough
CT: control target
= control target key end

     0   :  { %10 = vsyncpa [#allocation3], 0  ;;  %s1200_s0 = inlined_call_operand.hbm [shape: f32[2,8,32], index: 0, kind: input, shape index: {}]   ;;  %s1201_s1 = inlined_call_operand.hbm [shape: f32[32,64], index: 1, kind: input, shape index: {}]   ;;  %s1202_s2 = inlined_call_operand.hbm [shape: f32[1,64], index: 2, kind: input, shape index: {}]   ;;  %s1203_s3 = inlined_call_operand.hbm [shape: f32[2,8,32], index: 3, kind: output, shape index: {0}]   ;;  %s1204_s4 = inlined_call_operand.hbm [shape: f32[2,8,32], index: 4, kind: output, shape index: {1}]  }
   0x1   :  { %12 = vsyncpa [#allocation3 + $0x1], 0 }
   0x2   :  { %13 = vsyncpa [#allocation6], 0 }
   0x3   :  { %14 = vsyncpa [#allocation4], 0 }
   0x4   :  { %16 = vsyncpa [#allocation4 + $0x1], 0 }
   0x5   :  { %17 = vsyncpa [#allocation10], 0 }
   0x6   :  { %19 = vsyncpa [#allocation10 + $0x1], 0  ;;  %s908_s15 = smov 0   ;;  %s910_s16 = smov 0  }
   0x7   :  { %s912_s17 = smov 0   ;;  %s914_s18 = smov 0  }
   0x8   :  { %s916_s19 = smov 0   ;;  %s918_s20 = smov 0  }
   0x9 LB: > { %s528_s21 = sadd.s32 4294967295, %s870_s20   ;;  %s529_s22 = sadd.s32 4294967294, %s870_s20   ;;  %s870_s20 = sphi %s918_s20, %s25_s20   ;;  %s866_s19 = sphi %s916_s19, %s1226_s19   ;;  %s862_s18 = sphi %s914_s18, %s1225_s18   ;;  %s858_s17 = sphi %s912_s17, %s1224_s17   ;;  %s854_s16 = sphi %s910_s16, %s1223_s16   ;;  %s850_s15 = sphi %s908_s15, %s1222_s15  }
   0xa   : > { %p59_p0 = scmp.ne.s32.totalorder %s854_s16, %s850_s15  ;;  %p942_p1 = scmp.eq.s32.totalorder %s528_s21, 0 }
   0xb   : > { %p946_p2 = scmp.eq.s32.totalorder %s528_s21, 1  ;;  %p133_p3 = scmp.eq.s32.totalorder %s529_s22, 1 }
   0xc   : > { %s1209_s23 = scalar_select %p942_p1, 1, 0 }
   0xd   : > { %p952_p4 = por %p942_p1, %p59_p0  ;;  %p530_p5 = scmp.ge.s32.totalorder %s870_s20, 1 }
   0xe   : > { %p957_p6 = por %p133_p3, %p59_p0  ;;  %p168_p7 = scmp.lt.s32.totalorder %s870_s20, 3 }
   0xf   : > { %s1211_s25 = scalar_select %p952_p4, 1, 0 }
  0x10   : > { %s1212_s26 = scalar_select %p957_p6, 1, 0 }
  0x11   : > { %p962_p8 = pnand %p530_p5, %p168_p7  ;;  %s872_s28 = smov [#allocation5]  }
  0x12   : > { %s180_s29 = sshll.u32 %s872_s28, 4  ;;  %s873_s5 = smov [#allocation7]   ;;  %s966_s29 = int_to_ptr.vmem [resolvable:$true] %s180_s29 }
  0x13   : > { %p586_p9 = pneg %p962_p8  ;;  %s194_s6 = sshll.u32 %s873_s5, 4  ;;  %s977_s6 = int_to_ptr.vmem [resolvable:$true] %s194_s6 }
  0x14   : > { %s666_s9 = scalar_lea.hbm %s1201_s1, 512 }
  0x15   : > { %p973_p11 = pnand %p586_p9, %p942_p1  ;;  %p667_p12 = scmp.ne.s32.totalorder %s1201_s1, %s666_s9 }
  0x16   : > { %p673_p5 = scmp.lt.u32.totalorder %s666_s9, %s1201_s1 }
  0x17   : > { %p668_p13 = pneg %p973_p11 }
  0x19   : > { %p669_p0 = pnand %p668_p13, %p667_p12 }
  0x1b   : > { %p670_p3 = pneg %p669_p0 }
  0x1d   : > { %p675_p7 = pnand %p673_p5, %p670_p3 }
  0x1f   : > { %678 = shalt.err (!%p675_p7)
}
  0x20   : > { %s679_s14 = scalar_lea.vmem %s966_s29, 512  ;;  %p687_p1 = scmp.lt.s32.totalorder %s966_s29, %s966_s29 }
  0x21   : > { %p680_p9 = scmp.ne.s32.totalorder %s966_s29, %s679_s14  ;;  %p688_p12 = scmp.lt.s32.totalorder %s679_s14, %s679_s14 }
  0x23   : > { %p682_p10 = pnand %p680_p9, %p668_p13  ;;  %p689_p0 = por %p688_p12, %p687_p1 }
  0x25   : > { %p683_p6 = pneg %p682_p10 }
  0x27   : > { %p690_p4 = pnand %p689_p0, %p683_p6 }
  0x29   : > { %693 = shalt.err (!%p690_p4)
}
  0x2a   : > { %s874_s21 = smov 128   ;;  %s875_s22 = smov 8  }
  0x2b   : > { %589 = dma.hbm_to_vmem [thread:$0]  (!%p973_p11), %s1201_s1, 512, %s966_s29, [#allocation6], %s874_s21, %s874_s21, %s875_s22  }
  0x2c   : > { %s694_s9 = scalar_lea.hbm %s1202_s2, 16 }
  0x2d   : > { %p695_p1 = scmp.ne.s32.totalorder %s1202_s2, %s694_s9  ;;  %p701_p10 = scmp.lt.u32.totalorder %s694_s9, %s1202_s2 }
  0x2f   : > { %p697_p4 = pnand %p695_p1, %p668_p13 }
  0x31   : > { %p698_p6 = pneg %p697_p4 }
  0x33   : > { %p703_p3 = pnand %p701_p10, %p698_p6 }
  0x35   : > { %706 = shalt.err (!%p703_p3)
}
  0x36   : > { %s707_s29 = scalar_lea.vmem %s977_s6, 16  ;;  %s714_s14 = scalar_lea.vmem %s977_s6, 32 }
  0x37   : > { %p708_p5 = scmp.ne.s32.totalorder %s977_s6, %s707_s29  ;;  %p715_p12 = scmp.lt.s32.totalorder %s977_s6, %s977_s6 }
  0x38   : > { %p716_p0 = scmp.lt.s32.totalorder %s714_s14, %s707_s29 }
  0x39   : > { %p710_p7 = pnand %p708_p5, %p668_p13 }
  0x3a   : > { %p717_p1 = por %p716_p0, %p715_p12 }
  0x3b   : > { %p711_p9 = pneg %p710_p7 }
  0x3d   : > { %p718_p4 = pnand %p717_p1, %p711_p9 }
  0x3f   : > { %721 = shalt.err (!%p718_p4)
}
  0x40   : > { %592 = dma.hbm_to_vmem [thread:$0]  (!%p973_p11), %s1202_s2, 16, %s977_s6, [#allocation6]  }
  0x41   : > { %s37_s28 = sadd.s32 1, %s866_s19  ;;  %s46_s5 = sadd.s32 1, %s858_s17 }
  0x42   : > { %p39_p13 = scmp.ge.s32.totalorder %s37_s28, 2  ;;  %p53_p6 = scmp.ne.s32.totalorder %s858_s17, %s854_s16 }
  0x43   : > { %p54_p10 = scmp.eq.s32.totalorder %s870_s20, 0  ;;  %p606_p3 = scmp.lt.s32.totalorder %s870_s20, 2 }
  0x44   : > { %s1228_s28 = smov (%p39_p13, %s37_s28), 0  ;;  %p1042_p7 = por %p946_p2, %p53_p6 }
  0x45   : > { %p55_p5 = por %p54_p10, %p53_p6  ;;  %s41_s7 = ssub.s32 %s866_s19, %s1228_s28 }
  0x46   : > { %s1215_s30 = scalar_select %p1042_p7, 1, 0 }
  0x47   : > { %s205_s8 = sand.u32 1, %s858_s17   ;;  %p44_p9 = scmp.eq.s32.totalorder %s41_s7, 0 }
  0x48   : > { %s534_s6 = sshll.u32 %s205_s8, 3  ;;  %s535_s9 = sshll.u32 %s866_s19, 7 }
  0x49   : > { %s1051_s10 = scalar_select %p44_p9, %s858_s17, %s46_s5  }
  0x4a   : > { %s1056_s13 = scalar_lea.hbm %s1200_s0, %s535_s9  ;;  %s209_s24 = scalar_lea.vmem [#allocation2], %s534_s6 }
  0x4b   : > { %s217_s29 = sshll.u32 %s209_s24, 4  ;;  %p1060_p2 = pnand %p606_p3, %p55_p5  ;;  %s1064_s29 = int_to_ptr.vmem [resolvable:$true] %s217_s29 }
  0x4c   : > { %s206_s21 = scalar_lea.sflag [#allocation3], %s205_s8  ;;  %s722_s22 = scalar_lea.hbm %s1056_s13, 128 }
  0x4d   : > { %p723_p11 = scmp.ne.s32.totalorder %s1056_s13, %s722_s22  ;;  %p724_p12 = pneg %p1060_p2 }
  0x4e   : > { %s727_s6 = scalar_lea.hbm %s1200_s0, 256  ;;  %p728_p4 = scmp.lt.u32.totalorder %s1056_s13, %s1200_s0 }
  0x4f   : > { %p725_p0 = pnand %p724_p12, %p723_p11  ;;  %p729_p13 = scmp.lt.u32.totalorder %s727_s6, %s722_s22 }
  0x50   : > { %p731_p10 = scmp.lt.u32.totalorder %s722_s22, %s1056_s13 }
  0x51   : > { %p726_p1 = pneg %p725_p0  ;;  %p730_p6 = por %p729_p13, %p728_p4 }
  0x53   : > { %p732_p3 = por %p731_p10, %p730_p6 }
  0x55   : > { %p733_p5 = pnand %p732_p3, %p726_p1 }
  0x57   : > { %736 = shalt.err (!%p733_p5)
}
  0x58   : > { %s737_s8 = scalar_lea.vmem %s1064_s29, 128  ;;  %s876_s12 = smov [#allocation2]  }
  0x59   : > { %p738_p9 = scmp.ne.s32.totalorder %s1064_s29, %s737_s8  ;;  %s742_s24 = sshll.u32 %s876_s12, 4  ;;  %s743_s24 = int_to_ptr.vmem [resolvable:$false] %s742_s24 }
  0x5a   : > { %s744_s5 = scalar_lea.vmem %s743_s24, 256  ;;  %p745_p7 = scmp.lt.s32.totalorder %s1064_s29, %s743_s24 }
  0x5b   : > { %p740_p11 = pnand %p738_p9, %p724_p12  ;;  %p746_p4 = scmp.lt.s32.totalorder %s744_s5, %s737_s8 }
  0x5d   : > { %p741_p0 = pneg %p740_p11  ;;  %p747_p13 = por %p746_p4, %p745_p7 }
  0x5f   : > { %p748_p6 = pnand %p747_p13, %p741_p0 }
  0x61   : > { %751 = shalt.err (!%p748_p6)
}
  0x62   : > { %596 = dma.hbm_to_vmem [thread:$0]  (!%p1060_p2), %s1056_s13, 128, %s1064_s29, %s206_s21  }
  0x63   : > { %226 = sbr.rel (%p962_p8) target bundleno = 464 (0x1d0), region = 32  ;;  %s1094_s22 = sand.u32 (!%p962_p8), 1, %s854_s16  }
  0x64   : > { %s1097_s7 = sshll.u32 (!%p962_p8), %s1094_s22, 3  ;;  %s229_s6 = scalar_lea.sflag (!%p962_p8), [#allocation3], %s1094_s22 }
  0x65   : > { %s232_s9 = scalar_lea.vmem (!%p962_p8), [#allocation2], %s1097_s7  ;;  %p1217_p7 = scmp.ne.s32.totalorder (!%p962_p8), %s1211_s25, 0 }
  0x6a   : > { %833 = dma.done.wait (%p1217_p7), %s229_s6, 128  }
  0x6b   : > { %835 = vsyncadd (%p1217_p7), %s229_s6, 4294967168  ;;  %p1218_p2 = scmp.ne.s32.totalorder %s1209_s23, 0 }
  0x6d   : > { %837 = dma.done.wait (%p1218_p2), [#allocation6], 528  }
  0x6e   : > { %839 = vsyncadd (%p1218_p2), [#allocation6], 4294966768  ;;  %v877_v0 = vmov 0.0|0.0   ;;  %vm878_vm0 = vmmov 0   ;;  %v879_v1 = vmov 0.0   ;;  %v271_v2 = vld [vmem:[#allocation5] sm:$0xff] }
  0x6f   : > { %566 = vmatprep.subr.bf16.mxu0 %v877_v0  ;;  %563 = vmatprep.mubr.msk.f32.mxu0 %vm878_vm0, %v879_v1  ;;  %v272_v3 = vld [vmem:[#allocation5 + $0x8] sm:$0xff]  ;;  %v273_v4 = vld [vmem:[#allocation5 + $0x10] sm:$0xff]  ;;  %v274_v6 = vld [vmem:[#allocation5 + $0x18] sm:$0xff]  ;;  %vm282_vm1 = vcmask 261120   ;;  %s546_s23 = sshll.u32 %s862_s18, 7  ;;  %s262_s25 = scalar_lea.vmem [#allocation8], %s1097_s7 }
  0x70   : > { %v567_v5 = vpack.c.bf16 %v272_v3, %v271_v2  ;;  %v570_v7 = vpack.c.bf16 %v274_v6, %v273_v4  ;;  %v270_v8 = vld [vmem:[%s232_s9] sm:$0xff]  ;;  %v542_v9 = vld [vmem:[#allocation7] ss:$0 sm:$0xff]  ;;  %s382_s27 = sshll.u32 %s262_s25, 4  ;;  %s1117_s14 = scalar_lea.hbm %s1203_s3, %s546_s23  ;;  %s1119_s27 = int_to_ptr.vmem [resolvable:$true] %s382_s27 }
  0x71   : > { %s880_s21 = smov 96   ;;  %s363_s11 = scalar_lea.sflag [#allocation4], %s1094_s22 }
  0x72   : > { %568 = vmatpush3.bf16.msra.mxu0 %v567_v5  ;;  %s752_s8 = scalar_lea.vmem %s1119_s27, 128  ;;  %p1219_p12 = scmp.ne.s32.totalorder %s1215_s30, 0 }
  0x73   : > { %569 = vmatprep.subr.bf16.mxu0 %v877_v0  ;;  %p753_p8 = scmp.ne.s32.totalorder %s1119_s27, %s752_s8  ;;  %s881_s12 = smov [#allocation8]  }
  0x74   : > { %s756_s24 = sshll.u32 %s881_s12, 4  ;;  %s757_s24 = int_to_ptr.vmem [resolvable:$false] %s756_s24 }
  0x75   : > { %p754_p1 = pnand %p753_p8, %p1219_p12  ;;  %s758_s5 = scalar_lea.vmem %s757_s24, 256 }
  0x76   : > { %571 = vmatpush3.bf16.msra.mxu0 %v570_v7  ;;  %p759_p3 = scmp.lt.s32.totalorder %s1119_s27, %s757_s24  ;;  %p760_p5 = scmp.lt.s32.totalorder %s758_s5, %s752_s8 }
  0x77   : > { %p755_p10 = pneg %p754_p1 }
  0x78   : > { %p761_p9 = por %p760_p5, %p759_p3 }
  0x79   : > { %564 = vmatmul.mubr.msk.f32.vlgmr.msra.gmra.mrb[0].mxu0 %vm282_vm1, %v270_v8 }
  0x7a   : > { %p762_p11 = pnand %p761_p9, %p755_p10 }
 0x14c   : > { %v352_v10 = vpop.f32.mrb[0].mxu0 }
 0x14d   : > { %v353_v11 = vadd.f32 %v542_v9, %v352_v10  ;;  %v565_v12 = vpop.f32.mrb[1].mxu0 }
 0x14f   : > { %358 = vrot.lane.b32.xlu0 %v353_v11, %s880_s21  ;;  %356 = vst.msk [vmem:[%s262_s25] sm:$0xff] %vm282_vm1, %v353_v11 }
 0x150   : > { %765 = shalt.err (!%p762_p11)
}
 0x151   : > { %s766_s6 = scalar_lea.hbm %s1117_s14, 128  ;;  %s770_s13 = scalar_lea.hbm %s1203_s3, 256 }
 0x152   : > { %p767_p0 = scmp.ne.s32.totalorder %s1117_s14, %s766_s6  ;;  %p771_p6 = scmp.lt.u32.totalorder %s1117_s14, %s1203_s3 }
 0x153   : > { %p772_p7 = scmp.lt.u32.totalorder %s770_s13, %s766_s6  ;;  %p774_p8 = scmp.lt.u32.totalorder %s766_s6, %s1117_s14 }
 0x154   : > { %p768_p4 = pnand %p767_p0, %p1219_p12 }
 0x155   : > { %p773_p2 = por %p772_p7, %p771_p6 }
 0x156   : > { %p769_p13 = pneg %p768_p4 }
 0x157   : > { %p775_p1 = por %p774_p8, %p773_p2 }
 0x159   : > { %p776_p10 = pnand %p775_p1, %p769_p13 }
 0x15b   : > { %779 = shalt.err (!%p776_p10)
}
 0x15c   : > { %582 = dma.vmem_to_hbm [thread:$0]  (%p1219_p12), %s1119_s27, 128, %s1117_s14, %s363_s11  }
 0x15d   : > { %s269_s8 = scalar_lea.vmem [#allocation9], %s1097_s7  ;;  %s1150_s9 = scalar_lea.hbm %s1204_s4, %s546_s23 }
 0x15e   : > { %s396_s12 = sshll.u32 %s269_s8, 4  ;;  %s368_s6 = scalar_lea.sflag [#allocation10], %s1094_s22  ;;  %s1152_s12 = int_to_ptr.vmem [resolvable:$true] %s396_s12 }
 0x15f   : > { %s780_s25 = scalar_lea.vmem %s1152_s12, 128  ;;  %s882_s18 = smov [#allocation9]  }
 0x160   : > { %p781_p3 = scmp.ne.s32.totalorder %s1152_s12, %s780_s25  ;;  %s784_s7 = sshll.u32 %s882_s18, 4  ;;  %s785_s7 = int_to_ptr.vmem [resolvable:$false] %s784_s7 }
 0x161   : > { %s786_s27 = scalar_lea.vmem %s785_s7, 256  ;;  %p787_p11 = scmp.lt.s32.totalorder %s1152_s12, %s785_s7 }
 0x162   : > { %p782_p5 = pnand %p781_p3, %p1219_p12  ;;  %p788_p0 = scmp.lt.s32.totalorder %s786_s27, %s780_s25 }
 0x164   : > { %p783_p9 = pneg %p782_p5  ;;  %p789_p4 = por %p788_p0, %p787_p11 }
 0x166   : > { %p790_p13 = pnand %p789_p4, %p783_p9 }
 0x1c1   : > { %v359_v13 = vpop.permute.xlu0 %358 }
 0x1c2   : > { %361 = vst.msk [vmem:[%s269_s8] sm:$0xff] %vm282_vm1, %v359_v13 }
 0x1c3   : > { %793 = shalt.err (!%p790_p13)
}
 0x1c4   : > { %s794_s22 = scalar_lea.hbm %s1150_s9, 128  ;;  %s798_s11 = scalar_lea.hbm %s1204_s4, 256 }
 0x1c5   : > { %p795_p6 = scmp.ne.s32.totalorder %s1150_s9, %s794_s22  ;;  %p799_p8 = scmp.lt.u32.totalorder %s1150_s9, %s1204_s4 }
 0x1c6   : > { %p800_p1 = scmp.lt.u32.totalorder %s798_s11, %s794_s22  ;;  %p802_p3 = scmp.lt.u32.totalorder %s794_s22, %s1150_s9 }
 0x1c7   : > { %p796_p7 = pnand %p795_p6, %p1219_p12 }
 0x1c8   : > { %p801_p10 = por %p800_p1, %p799_p8 }
 0x1c9   : > { %p797_p2 = pneg %p796_p7 }
 0x1ca   : > { %p803_p5 = por %p802_p3, %p801_p10 }
 0x1cc   : > { %p804_p9 = pnand %p803_p5, %p797_p2 }
 0x1ce   : > { %807 = shalt.err (!%p804_p9)
}
 0x1cf   : > { %583 = dma.vmem_to_hbm [thread:$0]  (%p1219_p12), %s1152_s12, 128, %s1150_s9, %s368_s6  }
 0x1d0 PF: > { %s408_s21 = sand.u32 1, %s850_s15   ;;  %p1220_p11 = scmp.ne.s32.totalorder %s1212_s26, 0 }
 0x1d1   : > { %p1221_p0 = scmp.ge.s32.totalorder %s870_s20, 2  ;;  %s409_s8 = scalar_lea.sflag [#allocation4], %s408_s21 }
 0x1d3   : > { %p598_p4 = pnand %p1221_p0, %p1220_p11 }
 0x1d5   : > { %841 = dma.done.wait (!%p598_p4), %s409_s8, 128  }
 0x1d6   : > { %843 = vsyncadd (!%p598_p4), %s409_s8, 4294967168  ;;  %s418_s24 = scalar_lea.sflag [#allocation10], %s408_s21 }
 0x1d7   : > { %845 = dma.done.wait (!%p598_p4), %s418_s24, 128  }
 0x1d8   : > { %847 = vsyncadd (!%p598_p4), %s418_s24, 4294967168  ;;  %s25_s20 = sadd.s32 1, %s870_s20   ;;  %s1222_s15 = smov %s854_s16 }
 0x1d9   : > { %p22_p13 = scmp.ge.s32.totalorder %s25_s20, 4   ;;  %s1223_s16 = smov %s858_s17 }
 0x1da   : > { %s1224_s17 = smov %s1051_s10  ;;  %s1225_s18 = smov %s866_s19 }
 0x1db   : > { %s1226_s19 = smov %s1228_s28  ;;  %24 = sbr.rel (!%p22_p13) target bundleno = 9 (0x9), region = 102 }
 0x1e2   :  { %423 = vsyncpa [#allocation3], 1 }
 0x1e3   :  { %425 = vsyncpa [#allocation3 + $0x1], 1 }
 0x1e4   :  { %426 = vsyncpa [#allocation6], 1 }
 0x1e5   :  { %427 = vsyncpa [#allocation4], 1 }
 0x1e6   :  { %429 = vsyncpa [#allocation4 + $0x1], 1 }
 0x1e7   :  { %430 = vsyncpa [#allocation10], 1 }
 0x1e8   :  { %432 = vsyncpa [#allocation10 + $0x1], 1 }

</bundles_post_ra>
